<compile_context>
chip_gen: v6e
topology: v6e:2x2x1
jax: 0.10.0
libtpu: 0.0.40
codegen_flags: <defaults>
</compile_context>

<pallas_src>
import jax
import jax.numpy as jnp
from jax.experimental import pallas as pl
from jax.experimental.pallas import tpu as pltpu


_TN = 1024     # node tile (nodes per grid step along the parallel axis)
_TE = 32768    # edge tile (edges per grid step along the reduction axis)


def _degree_kernel(src_ref, deg_ref, acc_ref):
    # src_ref: (te//128, 128)   int32 edge sources for this edge tile (-1 = pad)
    # deg_ref: (tn//8, 8, 1)    x.dtype output for this node tile
    # acc_ref: (tn//8, 8, 128)  int32 exact accumulator (persists across edge tiles)
    ni = pl.program_id(0)
    ei = pl.program_id(1)
    n_sub = deg_ref.shape[0]       # 8-node sub-blocks in this node tile
    te_rows = src_ref.shape[0]     # 128-edge rows in this edge tile
    last_e = pl.num_programs(1) - 1
    tn = n_sub * 8

    # Hoisted constants (loop-invariant; JAX does not CSE broadcasts in loops).
    sub_iota = jax.lax.broadcasted_iota(jnp.int32, (8, 128), 0)
    zero_block = jnp.zeros((8, 128), jnp.int32)
    base0 = ni * tn

    def sub_block(b, carry):
        # Node ids of sub-block b on the 8 sublanes, replicated across lanes.
        nid = (base0 + b * 8) + sub_iota                        # (8, 128)

        def edge_row(c, partial):
            row = src_ref[pl.ds(c, 1), :]                       # (1, 128) dense load
            # sublane-broadcast compare + add: pure VALU, no lane movement
            return partial + (nid == row).astype(jnp.int32)

        partial = jax.lax.fori_loop(0, te_rows, edge_row, zero_block, unroll=8)

        @pl.when(ei == 0)
        def _():
            acc_ref[b] = partial

        @pl.when(ei > 0)
        def _():
            acc_ref[b] = acc_ref[b] + partial

        @pl.when(ei == last_e)
        def _():
            # One lane (XLU) reduce per sub-block; +1 self-loop and the cast
            # to x.dtype only at the final store.
            cnt = jnp.sum(acc_ref[b], axis=-1, keepdims=True)   # (8, 1) int32
            deg_ref[b] = (cnt + 1).astype(deg_ref.dtype)

        return carry

    jax.lax.fori_loop(0, n_sub, sub_block, 0)


def _round_up(a, m):
    return ((a + m - 1) // m) * m


def hook_degree(edge_index, x, *, tn=_TN, te=_TE):
    """Pallas implementation of HookDegree.forward(edge_index, x)."""
    N = x.shape[0]
    E = edge_index.shape[1]

    # Adaptive tiles: don't scan padding for small graphs.
    tn = max(8, min(tn, _round_up(N, 8)))          # multiple of 8 nodes
    te = max(1024, min(te, _round_up(E, 1024)))    # multiple of 1024 edges

    n_pad = _round_up(N, tn)
    e_pad = _round_up(E, te)

    # Edge sources packed densely as (e_pad//128, 128); the -1 sentinel can
    # never match a (non-negative) node id.
    src = edge_index[0].astype(jnp.int32)
    src = jnp.pad(src, (0, e_pad - E), constant_values=-1).reshape(e_pad // 128, 128)

    grid = (n_pad // tn, e_pad // te)   # node tiles outer (parallel), edge reduction last
    deg = pl.pallas_call(
        _degree_kernel,
        out_shape=jax.ShapeDtypeStruct((n_pad // 8, 8, 1), x.dtype),
        grid=grid,
        in_specs=[
            # Block index independent of ni (and a single edge tile for
            # typical E), so Pallas fetches the packed edge list once and
            # keeps it resident in VMEM across node tiles.
            pl.BlockSpec((te // 128, 128), lambda ni, ei: (ei, 0)),
        ],
        out_specs=pl.BlockSpec((tn // 8, 8, 1), lambda ni, ei: (ni, 0, 0)),
        scratch_shapes=[pltpu.VMEM((tn // 8, 8, 128), jnp.int32)],
        compiler_params=pltpu.CompilerParams(
            # Node tiles shard across TensorCores (v7x megacore); the edge
            # axis is the sequential reduction.
            dimension_semantics=("parallel", "arbitrary"),
        ),
    )(src)
    return deg.reshape(n_pad)[:N]


def hook_degree_ref(edge_index, x):
    """Pure-JAX reference for correctness checking."""
    N = x.shape[0]
    src = edge_index[0]
    counts = jax.ops.segment_sum(
        jnp.ones((src.shape[0],), dtype=jnp.float32), src, num_segments=N)
    return (counts + 1.0).astype(x.dtype)


if __name__ == "__main__":
    key = jax.random.PRNGKey(0)
    k1, k2, k3, k4 = jax.random.split(key, 4)

    # Toy shapes consistent with the module (heads=8 is unused by forward).
    N, F, E = 16, 8, 24
    edge_index = jax.random.randint(k1, (2, E), 0, N, dtype=jnp.int32)
    x = jax.random.normal(k2, (N, F), dtype=jnp.float32)

    deg = jax.block_until_ready(hook_degree(edge_index, x))
    deg_ref = hook_degree_ref(edge_index, x)
    assert deg.shape == (N,) and deg.dtype == x.dtype
    assert jnp.allclose(deg, deg_ref), (deg, deg_ref)

    # Multi-node-tile case: 2 node tiles on the parallel axis, single resident
    # edge block (fetched once, no edge-axis grid steps).
    N2, F2, E2 = 1300, 8, 5003
    edge_index2 = jax.random.randint(k3, (2, E2), 0, N2, dtype=jnp.int32)
    x2 = jax.random.normal(k4, (N2, F2), dtype=jnp.float32)

    deg2 = jax.block_until_ready(hook_degree(edge_index2, x2))
    deg2_ref = hook_degree_ref(edge_index2, x2)
    assert deg2.shape == (N2,) and deg2.dtype == x2.dtype
    assert jnp.allclose(deg2, deg2_ref), (deg2, deg2_ref)

    # Small edge tile forces several edge (reduction) grid steps to exercise
    # the cross-edge-tile int32 accumulator path.
    deg3 = jax.block_until_ready(hook_degree(edge_index2, x2, te=1024))
    assert jnp.allclose(deg3, deg2_ref), (deg3, deg2_ref)

    print("KERNEL_OK")
</pallas_src>

<mosaic_0001>
module attributes {stable_mosaic.version = 11 : i64} {
  func.func @_degree_kernel(%arg0: i32, %arg1: i32, %arg2: memref<8x128xi32, #tpu.memory_space<vmem>>, %arg3: memref<2x8x1xf32, #tpu.memory_space<vmem>>, %arg4: memref<2x8x128xi32, #tpu.memory_space<vmem>>) attributes {dimension_semantics = [#tpu.dimension_semantics<parallel>, #tpu.dimension_semantics<arbitrary>], iteration_bounds = array<i64: 1, 1>, scalar_prefetch = 0 : i64, scratch_operands = 1 : i64, tpu.core_type = #tpu.core_type<tc>, window_params = [{transform_indices = @transform_0, window_bounds = array<i64: 8, 128>}, {transform_indices = @transform_1, window_bounds = array<i64: 2, 8, 1>}]} {
    %0 = tpu.iota {dimensions = array<i32: 0>} : vector<8x128xi32>
    %c0_i32 = arith.constant 0 : i32
    %1 = vector.broadcast %c0_i32 : i32 to vector<8x128xi32>
    %c16_i32 = arith.constant 16 : i32
    %2 = arith.muli %arg0, %c16_i32 : i32
    %c0_i32_0 = arith.constant 0 : i32
    %c2_i32 = arith.constant 2 : i32
    %3 = arith.addi %c0_i32_0, %c2_i32 : i32
    %c1_i32 = arith.constant 1 : i32
    scf.for %arg5 = %c0_i32_0 to %3 step %c1_i32  : i32 {
      %c8_i32 = arith.constant 8 : i32
      %4 = arith.muli %arg5, %c8_i32 : i32
      %5 = arith.addi %2, %4 : i32
      %6 = vector.broadcast %5 : i32 to vector<8x128xi32>
      %7 = arith.addi %6, %0 : vector<8x128xi32>
      %c0_i32_2 = arith.constant 0 : i32
      %8 = arith.index_cast %c0_i32_2 : i32 to index
      %c0 = arith.constant 0 : index
      %9 = vector.load %arg2[%8, %c0] : memref<8x128xi32, #tpu.memory_space<vmem>>, vector<1x128xi32>
      %10 = vector.broadcast %9 : vector<1x128xi32> to vector<8x128xi32>
      %11 = arith.cmpi eq, %7, %10 : vector<8x128xi32>
      %12 = arith.extui %11 : vector<8x128xi1> to vector<8x128xi32>
      %13 = arith.addi %1, %12 : vector<8x128xi32>
      %c1_i32_3 = arith.constant 1 : i32
      %14 = arith.index_cast %c1_i32_3 : i32 to index
      %c0_4 = arith.constant 0 : index
      %15 = vector.load %arg2[%14, %c0_4] : memref<8x128xi32, #tpu.memory_space<vmem>>, vector<1x128xi32>
      %16 = vector.broadcast %15 : vector<1x128xi32> to vector<8x128xi32>
      %17 = arith.cmpi eq, %7, %16 : vector<8x128xi32>
      %18 = arith.extui %17 : vector<8x128xi1> to vector<8x128xi32>
      %19 = arith.addi %13, %18 : vector<8x128xi32>
      %c2_i32_5 = arith.constant 2 : i32
      %20 = arith.index_cast %c2_i32_5 : i32 to index
      %c0_6 = arith.constant 0 : index
      %21 = vector.load %arg2[%20, %c0_6] : memref<8x128xi32, #tpu.memory_space<vmem>>, vector<1x128xi32>
      %22 = vector.broadcast %21 : vector<1x128xi32> to vector<8x128xi32>
      %23 = arith.cmpi eq, %7, %22 : vector<8x128xi32>
      %24 = arith.extui %23 : vector<8x128xi1> to vector<8x128xi32>
      %25 = arith.addi %19, %24 : vector<8x128xi32>
      %c3_i32 = arith.constant 3 : i32
      %26 = arith.index_cast %c3_i32 : i32 to index
      %c0_7 = arith.constant 0 : index
      %27 = vector.load %arg2[%26, %c0_7] : memref<8x128xi32, #tpu.memory_space<vmem>>, vector<1x128xi32>
      %28 = vector.broadcast %27 : vector<1x128xi32> to vector<8x128xi32>
      %29 = arith.cmpi eq, %7, %28 : vector<8x128xi32>
      %30 = arith.extui %29 : vector<8x128xi1> to vector<8x128xi32>
      %31 = arith.addi %25, %30 : vector<8x128xi32>
      %c4_i32 = arith.constant 4 : i32
      %32 = arith.index_cast %c4_i32 : i32 to index
      %c0_8 = arith.constant 0 : index
      %33 = vector.load %arg2[%32, %c0_8] : memref<8x128xi32, #tpu.memory_space<vmem>>, vector<1x128xi32>
      %34 = vector.broadcast %33 : vector<1x128xi32> to vector<8x128xi32>
      %35 = arith.cmpi eq, %7, %34 : vector<8x128xi32>
      %36 = arith.extui %35 : vector<8x128xi1> to vector<8x128xi32>
      %37 = arith.addi %31, %36 : vector<8x128xi32>
      %c5_i32 = arith.constant 5 : i32
      %38 = arith.index_cast %c5_i32 : i32 to index
      %c0_9 = arith.constant 0 : index
      %39 = vector.load %arg2[%38, %c0_9] : memref<8x128xi32, #tpu.memory_space<vmem>>, vector<1x128xi32>
      %40 = vector.broadcast %39 : vector<1x128xi32> to vector<8x128xi32>
      %41 = arith.cmpi eq, %7, %40 : vector<8x128xi32>
      %42 = arith.extui %41 : vector<8x128xi1> to vector<8x128xi32>
      %43 = arith.addi %37, %42 : vector<8x128xi32>
      %c6_i32 = arith.constant 6 : i32
      %44 = arith.index_cast %c6_i32 : i32 to index
      %c0_10 = arith.constant 0 : index
      %45 = vector.load %arg2[%44, %c0_10] : memref<8x128xi32, #tpu.memory_space<vmem>>, vector<1x128xi32>
      %46 = vector.broadcast %45 : vector<1x128xi32> to vector<8x128xi32>
      %47 = arith.cmpi eq, %7, %46 : vector<8x128xi32>
      %48 = arith.extui %47 : vector<8x128xi1> to vector<8x128xi32>
      %49 = arith.addi %43, %48 : vector<8x128xi32>
      %c7_i32 = arith.constant 7 : i32
      %50 = arith.index_cast %c7_i32 : i32 to index
      %c0_11 = arith.constant 0 : index
      %51 = vector.load %arg2[%50, %c0_11] : memref<8x128xi32, #tpu.memory_space<vmem>>, vector<1x128xi32>
      %52 = vector.broadcast %51 : vector<1x128xi32> to vector<8x128xi32>
      %53 = arith.cmpi eq, %7, %52 : vector<8x128xi32>
      %54 = arith.extui %53 : vector<8x128xi1> to vector<8x128xi32>
      %55 = arith.addi %49, %54 : vector<8x128xi32>
      %c8_i32_12 = arith.constant 8 : i32
      %c0_i32_13 = arith.constant 0 : i32
      %56 = arith.cmpi eq, %arg1, %c0_i32_13 : i32
      %57 = arith.extui %56 : i1 to i32
      %c0_i32_14 = arith.constant 0 : i32
      %58 = arith.cmpi ne, %57, %c0_i32_14 : i32
      scf.if %58 {
        %65 = arith.index_cast %arg5 : i32 to index
        %c0_19 = arith.constant 0 : index
        %c0_20 = arith.constant 0 : index
        %66 = vector.load %arg4[%65, %c0_19, %c0_20] : memref<2x8x128xi32, #tpu.memory_space<vmem>>, vector<1x8x128xi32>
        %67 = vector.shape_cast %66 : vector<1x8x128xi32> to vector<8x128xi32>
        %68 = vector.shape_cast %55 : vector<8x128xi32> to vector<1x8x128xi32>
        tpu.vector_store %arg4[%65, %c0_19, %c0_20], %68 {strides = array<i32>} : memref<2x8x128xi32, #tpu.memory_space<vmem>>, vector<1x8x128xi32>,
      } else {
      }
      %c0_i32_15 = arith.constant 0 : i32
      %59 = arith.cmpi sgt, %arg1, %c0_i32_15 : i32
      %60 = arith.extui %59 : i1 to i32
      %c0_i32_16 = arith.constant 0 : i32
      %61 = arith.cmpi ne, %60, %c0_i32_16 : i32
      scf.if %61 {
        %65 = arith.index_cast %arg5 : i32 to index
        %c0_19 = arith.constant 0 : index
        %c0_20 = arith.constant 0 : index
        %66 = vector.load %arg4[%65, %c0_19, %c0_20] : memref<2x8x128xi32, #tpu.memory_space<vmem>>, vector<1x8x128xi32>
        %67 = vector.shape_cast %66 : vector<1x8x128xi32> to vector<8x128xi32>
        %68 = arith.addi %67, %55 : vector<8x128xi32>
        %69 = arith.index_cast %arg5 : i32 to index
        %c0_21 = arith.constant 0 : index
        %c0_22 = arith.constant 0 : index
        %70 = vector.load %arg4[%69, %c0_21, %c0_22] : memref<2x8x128xi32, #tpu.memory_space<vmem>>, vector<1x8x128xi32>
        %71 = vector.shape_cast %70 : vector<1x8x128xi32> to vector<8x128xi32>
        %72 = vector.shape_cast %68 : vector<8x128xi32> to vector<1x8x128xi32>
        tpu.vector_store %arg4[%69, %c0_21, %c0_22], %72 {strides = array<i32>} : memref<2x8x128xi32, #tpu.memory_space<vmem>>, vector<1x8x128xi32>,
      } else {
      }
      %c0_i32_17 = arith.constant 0 : i32
      %62 = arith.cmpi eq, %arg1, %c0_i32_17 : i32
      %63 = arith.extui %62 : i1 to i32
      %c0_i32_18 = arith.constant 0 : i32
      %64 = arith.cmpi ne, %63, %c0_i32_18 : i32
      scf.if %64 {
        %65 = arith.index_cast %arg5 : i32 to index
        %c0_19 = arith.constant 0 : index
        %c0_20 = arith.constant 0 : index
        %66 = vector.load %arg4[%65, %c0_19, %c0_20] : memref<2x8x128xi32, #tpu.memory_space<vmem>>, vector<1x8x128xi32>
        %67 = vector.shape_cast %66 : vector<1x8x128xi32> to vector<8x128xi32>
        %cst = arith.constant dense<0> : vector<8xi32>
        %68 = vector.multi_reduction <add>, %67, %cst [1] : vector<8x128xi32> to vector<8xi32>
        %69 = vector.shape_cast %68 : vector<8xi32> to vector<8x1xi32>
        %c1_i32_21 = arith.constant 1 : i32
        %70 = vector.broadcast %c1_i32_21 : i32 to vector<8x1xi32>
        %71 = arith.addi %69, %70 : vector<8x1xi32>
        %72 = arith.sitofp %71 : vector<8x1xi32> to vector<8x1xf32>
        %73 = arith.index_cast %arg5 : i32 to index
        %c0_22 = arith.constant 0 : index
        %c0_23 = arith.constant 0 : index
        %74 = vector.load %arg3[%73, %c0_22, %c0_23] : memref<2x8x1xf32, #tpu.memory_space<vmem>>, vector<1x8x1xf32>
        %75 = vector.shape_cast %74 : vector<1x8x1xf32> to vector<8x1xf32>
        %76 = vector.shape_cast %72 : vector<8x1xf32> to vector<1x8x1xf32>
        tpu.vector_store %arg3[%73, %c0_22, %c0_23], %76 {strides = array<i32>} : memref<2x8x1xf32, #tpu.memory_space<vmem>>, vector<1x8x1xf32>,
      } else {
      }
    }
    %c2_i32_1 = arith.constant 2 : i32
    return
  }
  func.func @transform_0(%arg0: i32, %arg1: i32) -> (i32, i32) {
    %c0_i32 = arith.constant 0 : i32
    %c0_i32_0 = arith.constant 0 : i32
    return %arg1, %c0_i32 : i32, i32
  }
  func.func @transform_1(%arg0: i32, %arg1: i32) -> (i32, i32, i32) {
    %c0_i32 = arith.constant 0 : i32
    %c0_i32_0 = arith.constant 0 : i32
    %c0_i32_1 = arith.constant 0 : i32
    return %arg0, %c0_i32, %c0_i32_0 : i32, i32, i32
  }
}

</mosaic_0001>

<bundles_post_ra>
// kernel: tpu_custom_call.1
= control target key start
LH: loop header
LB: loop body
LE: loop exit
PB: predicated region body
PF: predicated region fallthrough
CT: control target
= control target key end

     0   :  { %6 = vsyncpa [#allocation4], 0  ;;  %s199_s6 = smov [#allocation3]   ;;  %s230_s0 = inlined_call_operand.hbm [shape: s32[8,128], index: 0, kind: input, shape index: {}]   ;;  %s231_s1 = inlined_call_operand.vmem [shape: f32[2,8,1], index: 1, kind: output, shape index: {}]  }
   0x1   :  { %s13_s7 = sshll.u32 %s199_s6, 4  ;;  %s14_s7 = int_to_ptr.vmem [resolvable:$true] %s13_s7 }
   0x2   :  { %s177_s8 = scalar_lea.vmem %s14_s7, 128  ;;  %p182_p1 = scmp.lt.s32.totalorder %s14_s7, %s14_s7 }
   0x3   :  { %p178_p0 = scmp.ne.s32.totalorder %s14_s7, %s177_s8  ;;  %p183_p2 = scmp.lt.s32.totalorder %s177_s8, %s177_s8 }
   0x5   :  { %p184_p3 = por %p183_p2, %p182_p1 }
   0x7   :  { %p185_p4 = pnand %p184_p3, %p178_p0 }
   0x9   :  { %188 = shalt.err (!%p185_p4)
}
   0xa   :  { %16 = dma.hbm_to_vmem [thread:$0]  %s230_s0, 128, %s14_s7, [#allocation4]  }
   0xb   :  { %193 = dma.done.wait [#allocation4], 128  }
   0xc   :  { %194 = vsyncadd [#allocation4], 4294967168  ;;  %v20_v0 = vlaneseq  ;;  %s214_s11 = smov 0  }
   0xe   :  { %v21_v1 = vshrl.u32 %v20_v0, 7 }
   0xf LB: > { %s150_s12 = sshll.u32 %s197_s11, 3  ;;  %v151_v2 = vld [vmem:[#allocation3] ss:$0 sm:$0xff]  ;;  %v152_v4 = vld [vmem:[#allocation3 + $0x1] ss:$0 sm:$0xff]  ;;  %v200_v9 = vmov 0   ;;  %s197_s11 = sphi %s214_s11, %s28_s11  }
  0x10   : > { %v31_v3 = vstv %s150_s12  ;;  %v153_v5 = vld [vmem:[#allocation3 + $0x2] ss:$0 sm:$0xff]  ;;  %v154_v6 = vld [vmem:[#allocation3 + $0x3] ss:$0 sm:$0xff]  ;;  %v155_v8 = vld [vmem:[#allocation3 + $0x4] ss:$0 sm:$0xff]  ;;  %s129_s14 = scalar_lea.vmem %s231_s1, %s150_s12 }
  0x11   : > { %v32_v7 = vadd.s32 %v31_v3, %v21_v1  ;;  %v156_v13 = vld [vmem:[#allocation3 + $0x5] ss:$0 sm:$0xff]  ;;  %v157_v16 = vld [vmem:[#allocation3 + $0x6] ss:$0 sm:$0xff]  ;;  %v158_v19 = vld [vmem:[#allocation3 + $0x7] ss:$0 sm:$0xff] }
  0x12   : > { %vm130_vm8 = vcmask 7168   ;;  %s28_s11 = sadd.s32 1, %s197_s11  }
  0x13   : > { %vm38_vm0 = vcmp.eq.s32.totalorder %v32_v7, %v151_v2  ;;  %vm45_vm1 = vcmp.eq.s32.totalorder %v32_v7, %v152_v4  ;;  %vm53_vm2 = vcmp.eq.s32.totalorder %v32_v7, %v153_v5  ;;  %vm61_vm3 = vcmp.eq.s32.totalorder %v32_v7, %v154_v6  ;;  %p25_p5 = scmp.ge.s32.totalorder %s28_s11, 2  }
  0x14   : > { %v39_v10 = vsel %vm38_vm0, 1, %v200_v9  ;;  %v46_v11 = vsel %vm45_vm1, 1, %v200_v9  ;;  %v54_v12 = vsel %vm53_vm2, 1, %v200_v9  ;;  %vm69_vm4 = vcmp.eq.s32.totalorder %v32_v7, %v155_v8 }
  0x15   : > { %v47_v14 = vadd.s32 %v46_v11, %v39_v10  ;;  %v62_v15 = vsel %vm61_vm3, 1, %v200_v9  ;;  %vm77_vm5 = vcmp.eq.s32.totalorder %v32_v7, %v156_v13  ;;  %v70_v18 = vsel %vm69_vm4, 1, %v200_v9 }
  0x16   : > { %vm85_vm6 = vcmp.eq.s32.totalorder %v32_v7, %v157_v16  ;;  %v78_v21 = vsel %vm77_vm5, 1, %v200_v9  ;;  %vm93_vm7 = vcmp.eq.s32.totalorder %v32_v7, %v158_v19 }
  0x17   : > { %v55_v17 = vadd.s32 %v54_v12, %v47_v14  ;;  %v86_v23 = vsel %vm85_vm6, 1, %v200_v9  ;;  %v94_v25 = vsel %vm93_vm7, 1, %v200_v9 }
  0x19   : > { %v63_v20 = vadd.s32 %v62_v15, %v55_v17 }
  0x1b   : > { %v71_v22 = vadd.s32 %v70_v18, %v63_v20 }
  0x1d   : > { %v79_v24 = vadd.s32 %v78_v21, %v71_v22 }
  0x1f   : > { %v87_v26 = vadd.s32 %v86_v23, %v79_v24 }
  0x21   : > { %v95_v27 = vadd.s32 %v94_v25, %v87_v26 }
  0x23   : > { %v116_v28 = vshrl.u32 %v95_v27, 16  ;;  %v115_v29 = vand.u32 65535, %v95_v27 }
  0x25   : > { %v118_v30 = vcvt.s32.f32 %v116_v28  ;;  %v117_v31 = vcvt.s32.f32 %v115_v29 }
  0x27   : > { %121 = vadd.xlane.f32.xlu0 %v118_v30 }
  0x2b   : > { %119 = vadd.xlane.f32.xlu0 %v117_v31 }
  0xb0   : > { %v122_v32 = vpop.xlane.xlu0 %121 }
  0xb1   : > { %v124_v33 = vcvt.f32.s32 %v122_v32 }
  0xb3   : > { %v125_v35 = vshll.u32 %v124_v33, 16 }
  0xb4   : > { %v120_v34 = vpop.xlane.xlu0 %119 }
  0xb5   : > { %v123_v36 = vcvt.f32.s32 %v120_v34 }
  0xb7   : > { %v126_v37 = vadd.s32 %v125_v35, %v123_v36 }
  0xb9   : > { %v127_v38 = vadd.s32 1, %v126_v37  ;;  %27 = sbr.rel (!%p25_p5) target bundleno = 15 (0xf), region = 51 }
  0xbb   : > { %v128_v39 = vcvt.s32.f32 %v127_v38 }
  0xbd   : > { %131 = vst.msk [vmem:[%s129_s14] sm:$0xff] %vm130_vm8, %v128_v39 }
  0xbe   :  { %136 = vsyncpa [#allocation4], 1 }

</bundles_post_ra>
